<compile_context>
chip_gen: v7x
topology: tpu7x:2x2x1
jax: 0.10.0
libtpu: 0.0.40
codegen_flags: <defaults>
</compile_context>

<pallas_src>
import functools
import numpy as np
import jax
import jax.numpy as jnp
from jax.experimental import pallas as pl
from jax.experimental.pallas import tpu as pltpu

_REPS = 10
_LANE = 128                       # lane width for the encoding axis
_VMEM_BUDGET_BYTES = 20 << 20     # tile budget (double-buffered in+out), all gens
_VMEM_LIMIT_BYTES = 32 << 20      # explicit scoped-VMEM limit (>= v5e default 16MiB)
_ABSENT = -(10 ** 6)              # code for "no path step here" (never matches key)
_INVALID = 10 ** 6                # key for padded encoding columns (never matches code)


def _round_up(x, m):
    return ((x + m - 1) // m) * m


# --------------------------------------------------------------------------------------
# Host-side (string) preprocessing — text parsing has no Pallas/JAX equivalent.
# --------------------------------------------------------------------------------------
def lr_positions_from_brackets(bracketed_sentence):
    """Parse a bracketed sentence into L/R root-to-leaf paths, one per word.
    First child of a constituent -> 'L', later children -> 'R'."""
    tokens = bracketed_sentence.replace("(", " ( ").replace(")", " ) ").split()
    paths = []
    pos = 0

    def parse(prefix):
        nonlocal pos
        tok = tokens[pos]
        if tok == "(":
            pos += 1
            idx = 0
            while tokens[pos] != ")":
                parse(prefix + ("L" if idx == 0 else "R"))
                idx += 1
            pos += 1  # consume ')'
        else:
            paths.append(prefix)
            pos += 1

    parse("")
    return paths


def lr_position_to_encoding_ref(lr_position, reps=10, dim=24):
    """Pure-python reference identical to the PyTorch helper (for verification)."""
    final_emb = []
    for _ in range(reps):
        count = 0
        for lr in lr_position:
            if lr == "L":
                if count < dim:
                    final_emb.append(1)
                    count += 1
                if count < dim:
                    final_emb.append(0)
                    count += 1
            elif lr == "R":
                if count < dim:
                    final_emb.append(0)
                    count += 1
                if count < dim:
                    final_emb.append(1)
                    count += 1
        if count < dim:
            for _ in range(dim - count):
                final_emb.append(0)
    return final_emb


# --------------------------------------------------------------------------------------
# Pallas kernel: expand the compact per-word path codes into the 0/1 encoding.
# For column c (valid): key[c] = 2*(d//2) + d%2 with d = c % dim, so
#   out[i, c] = 1  iff  codes[i, d//2] == d%2,
# i.e. for step j:  codes[i, j] == key[c] - 2*j  matches exactly when the column
# belongs to step j and the parity matches (sentinels guarantee no false hits).
# --------------------------------------------------------------------------------------
def _tree_pos_kernel(key_ref, codes_ref, out_ref, *, steps):
    key = key_ref[...]                               # (1, enc_pad) int32
    acc = codes_ref[:, 0:1] == key                   # (block_n, enc_pad) bool
    for j in range(1, steps):                        # steps = ceil(dim/2): tiny, unrolled
        acc = acc | (codes_ref[:, j:j + 1] == (key - 2 * j))
    out_ref[...] = acc.astype(out_ref.dtype)


def _choose_tiling(n, enc_pad, steps, out_itemsize):
    """Pick (n_pad, block_n): power-of-2 N bucket (limits recompiles), block_n from a
    VMEM byte budget, >=2 grid steps for large batches so both v7x TCs get work."""
    row_align = max(8, 32 // out_itemsize)            # f32:8, bf16:16, int8:32 sublane floor
    n_bucket = max(row_align, 1 << max(n - 1, 0).bit_length())
    # Double-buffered output tile + codes tile per row (key row is negligible).
    per_row_bytes = 2 * (enc_pad * out_itemsize + steps * 4)
    budget_rows = max(row_align, _VMEM_BUDGET_BYTES // per_row_bytes)
    blk = 1 << (budget_rows.bit_length() - 1)         # largest pow2 <= budget
    block_n = min(n_bucket, blk)
    if n_bucket >= 1024:                              # ensure >=2 parallel tiles (v7x 2 TCs)
        block_n = min(block_n, n_bucket // 2)
    block_n = max(row_align, block_n)                 # pow2, divides n_bucket
    return n_bucket, block_n


@functools.lru_cache(maxsize=None)
def _build_encoder(n_pad, enc_pad, steps, block_n, out_dtype_name):
    out_dtype = jnp.dtype(out_dtype_name)
    grid = (n_pad // block_n,)
    kernel = functools.partial(_tree_pos_kernel, steps=steps)
    call = pl.pallas_call(
        kernel,
        out_shape=jax.ShapeDtypeStruct((n_pad, enc_pad), out_dtype),
        grid=grid,
        in_specs=[
            pl.BlockSpec((1, enc_pad), lambda i: (0, 0)),        # key row (replicated, tiny)
            pl.BlockSpec((block_n, steps), lambda i: (i, 0)),    # compact codes tile
        ],
        out_specs=pl.BlockSpec((block_n, enc_pad), lambda i: (i, 0)),
        compiler_params=pltpu.CompilerParams(
            dimension_semantics=("parallel",),   # shard N over v7x's 2 TCs; no-op on v5e/v6e
            vmem_limit_bytes=_VMEM_LIMIT_BYTES,
        ),
    )
    return jax.jit(call)


def _host_prepare(lr_positions, dim, out_dtype):
    """Numpy-only prep: compact codes table + key row + tiling parameters."""
    enc_len = _REPS * dim
    enc_pad = enc_len if enc_len % _LANE == 0 else _round_up(enc_len, _LANE)
    steps = max(1, (dim + 1) // 2)          # only the first ceil(dim/2) path steps matter
    n = len(lr_positions)
    itemsize = jnp.dtype(out_dtype).itemsize
    n_pad, block_n = _choose_tiling(max(n, 1), enc_pad, steps, itemsize)

    codes = np.full((n_pad, steps), _ABSENT, dtype=np.int32)
    for i, p in enumerate(lr_positions):
        for j, ch in enumerate(p[:steps]):
            codes[i, j] = 0 if ch == "L" else 1

    col = np.arange(enc_pad)
    valid = col < enc_len
    d = np.where(valid, col % dim, 0)
    key = np.where(valid, 2 * (d // 2) + (d % 2), _INVALID).astype(np.int32)
    return key.reshape(1, enc_pad), codes, n_pad, enc_pad, enc_len, block_n, steps


def _encode(lr_positions, dim, out_dtype=jnp.float32):
    key_row, codes, n_pad, enc_pad, enc_len, block_n, steps = _host_prepare(
        lr_positions, dim, out_dtype
    )
    encoder = _build_encoder(n_pad, enc_pad, steps, block_n, jnp.dtype(out_dtype).name)
    out = encoder(jnp.asarray(key_row), jnp.asarray(codes))
    return out, enc_len


def tree_positional_encoding(word_emb, bracketed_sentence, hidden_size,
                             out_dtype=jnp.float32):
    """JAX/Pallas equivalent of TreePositionalEncoding(hidden_size).forward(...)."""
    del word_emb  # unused by the original forward as well
    assert hidden_size >= 10, "hidden_size must be >= 10 (dim = hidden_size // 10)"
    lr_positions = lr_positions_from_brackets(bracketed_sentence)
    dim = hidden_size // 10
    n = len(lr_positions)
    out, enc_len = _encode(lr_positions, dim, out_dtype)
    # torch builds [[emb], [emb], ...] -> (N, 1, reps*dim); single trim op on device.
    return out[:n, :enc_len].reshape(n, 1, enc_len)


def tree_positional_encoding_batch(bracketed_sentences, hidden_size,
                                   out_dtype=jnp.float32):
    """Encode many sentences with ONE pallas_call; split on host (one D2H transfer,
    no per-sentence device slice/reshape dispatches)."""
    assert hidden_size >= 10, "hidden_size must be >= 10 (dim = hidden_size // 10)"
    dim = hidden_size // 10
    all_paths, counts = [], []
    for s in bracketed_sentences:
        p = lr_positions_from_brackets(s)
        all_paths.extend(p)
        counts.append(len(p))
    out, enc_len = _encode(all_paths, dim, out_dtype)
    out_host = np.asarray(jax.device_get(out))     # single transfer of the packed block
    results, start = [], 0
    for c in counts:
        results.append(out_host[start:start + c, :enc_len].reshape(c, 1, enc_len))
        start += c
    return results


if __name__ == "__main__":
    hidden_size = 40  # dim = 4, reps = 10 -> encoding length 40 (lane-padded to 128)
    sent_a = "( ( ( w0 w1 ) ( w2 w3 ) ) ( ( w4 w5 ) ( w6 w7 ) ) )"  # 8 words
    sent_b = "( w0 ( w1 ( w2 w3 ) ) )"                               # 4 words

    prng = jax.random.PRNGKey(0)
    word_emb = jax.random.normal(prng, (8, 1, hidden_size), dtype=jnp.float32)  # unused, as in torch
    dim = hidden_size // 10

    # Single-sentence forward (matches the torch module signature/semantics).
    out = tree_positional_encoding(word_emb, sent_a, hidden_size)
    out = jax.block_until_ready(out)
    ref = np.asarray(
        [[lr_position_to_encoding_ref(list(p), reps=_REPS, dim=dim)]
         for p in lr_positions_from_brackets(sent_a)],
        dtype=np.float32,
    )
    np.testing.assert_allclose(np.asarray(out), ref, rtol=0, atol=0)

    # Batched path: one pallas_call for both sentences, host-side split.
    outs = tree_positional_encoding_batch([sent_a, sent_b], hidden_size)
    for s, o in zip([sent_a, sent_b], outs):
        r = np.asarray(
            [[lr_position_to_encoding_ref(list(p), reps=_REPS, dim=dim)]
             for p in lr_positions_from_brackets(s)],
            dtype=np.float32,
        )
        np.testing.assert_allclose(np.asarray(o), r, rtol=0, atol=0)

    # Odd dim (hidden_size=50 -> dim=5, steps=3) exercises the multi-step unrolled loop.
    hs2 = 50
    dim2 = hs2 // 10
    out2 = jax.block_until_ready(tree_positional_encoding(word_emb, sent_b, hs2))
    ref2 = np.asarray(
        [[lr_position_to_encoding_ref(list(p), reps=_REPS, dim=dim2)]
         for p in lr_positions_from_brackets(sent_b)],
        dtype=np.float32,
    )
    np.testing.assert_allclose(np.asarray(out2), ref2, rtol=0, atol=0)

    print("KERNEL_OK")
</pallas_src>

<mosaic_0001>
module attributes {stable_mosaic.version = 11 : i64} {
  func.func @_tree_pos_kernel(%arg0: i32, %arg1: memref<1x128xi32, #tpu.memory_space<vmem>>, %arg2: memref<8x2xi32, #tpu.memory_space<vmem>>, %arg3: memref<8x128xf32, #tpu.memory_space<vmem>>) attributes {dimension_semantics = [#tpu.dimension_semantics<parallel>], iteration_bounds = array<i64: 1>, scalar_prefetch = 0 : i64, scratch_operands = 0 : i64, tpu.core_type = #tpu.core_type<tc>, window_params = [{pipeline_mode = #tpu.pipeline_mode<synchronous>, transform_indices = @transform_0, window_bounds = array<i64: 1, 128>}, {transform_indices = @transform_1, window_bounds = array<i64: 8, 2>}, {transform_indices = @transform_2, window_bounds = array<i64: 8, 128>}]} {
    %c0 = arith.constant 0 : index
    %c0_0 = arith.constant 0 : index
    %0 = vector.load %arg1[%c0, %c0_0] : memref<1x128xi32, #tpu.memory_space<vmem>>, vector<1x128xi32>
    %c0_1 = arith.constant 0 : index
    %c0_2 = arith.constant 0 : index
    %1 = vector.load %arg2[%c0_1, %c0_2] : memref<8x2xi32, #tpu.memory_space<vmem>>, vector<8x1xi32>
    %2 = vector.broadcast %1 : vector<8x1xi32> to vector<8x128xi32>
    %3 = vector.broadcast %0 : vector<1x128xi32> to vector<8x128xi32>
    %4 = arith.cmpi eq, %2, %3 : vector<8x128xi32>
    %c0_3 = arith.constant 0 : index
    %c1 = arith.constant 1 : index
    %5 = vector.load %arg2[%c0_3, %c1] : memref<8x2xi32, #tpu.memory_space<vmem>>, vector<8x1xi32>
    %c2_i32 = arith.constant 2 : i32
    %6 = vector.broadcast %c2_i32 : i32 to vector<1x128xi32>
    %7 = arith.subi %0, %6 : vector<1x128xi32>
    %8 = vector.broadcast %5 : vector<8x1xi32> to vector<8x128xi32>
    %9 = vector.broadcast %7 : vector<1x128xi32> to vector<8x128xi32>
    %10 = arith.cmpi eq, %8, %9 : vector<8x128xi32>
    %11 = arith.ori %4, %10 : vector<8x128xi1>
    %12 = arith.extui %11 : vector<8x128xi1> to vector<8x128xi32>
    %13 = arith.sitofp %12 : vector<8x128xi32> to vector<8x128xf32>
    %c0_4 = arith.constant 0 : index
    %c0_5 = arith.constant 0 : index
    %14 = vector.load %arg3[%c0_4, %c0_5] : memref<8x128xf32, #tpu.memory_space<vmem>>, vector<8x128xf32>
    tpu.vector_store %arg3[%c0_4, %c0_5], %13 {strides = array<i32>} : memref<8x128xf32, #tpu.memory_space<vmem>>, vector<8x128xf32>,
    return
  }
  func.func @transform_0(%arg0: i32) -> (i32, i32) {
    %c0_i32 = arith.constant 0 : i32
    %c0_i32_0 = arith.constant 0 : i32
    %c0_i32_1 = arith.constant 0 : i32
    return %c0_i32, %c0_i32_0 : i32, i32
  }
  func.func @transform_1(%arg0: i32) -> (i32, i32) {
    %c0_i32 = arith.constant 0 : i32
    %c0_i32_0 = arith.constant 0 : i32
    return %arg0, %c0_i32 : i32, i32
  }
  func.func @transform_2(%arg0: i32) -> (i32, i32) {
    %c0_i32 = arith.constant 0 : i32
    %c0_i32_0 = arith.constant 0 : i32
    return %arg0, %c0_i32 : i32, i32
  }
}

</mosaic_0001>

<bundles_post_ra>
// kernel: tpu_custom_call.1
= control target key start
LH: loop header
LB: loop body
LE: loop exit
PB: predicated region body
PF: predicated region fallthrough
CT: control target
= control target key end

     0   :  { %v81_v1 = vmov 0   ;;  %s118_s0 = inlined_call_operand.vmem [shape: s32[1,128], index: 0, kind: input, shape index: {}]   ;;  %s119_s1 = inlined_call_operand.vmem [shape: s32[8,2], index: 1, kind: input, shape index: {}]   ;;  %s120_s2 = inlined_call_operand.hbm [shape: f32[8,128], index: 2, kind: output, shape index: {}]  }
   0x1   :  { %v13_v0 = vld [vmem:[%s119_s1] sm:$0xff]  ;;  %55 = vset.pattern.permute.xlu0 %v81_v1 }
   0x2   :  { %7 = vsyncpa [#allocation3], 0  ;;  %15 = vperm.xlu0 %55, %v13_v0   ;;  %v82_v2 = vmov 1   ;;  %v17_v3 = vlaneseq  ;;  %v12_v5 = vld [vmem:[%s118_s0] sm:$0x1]  ;;  %s83_s13 = smov [#allocation2]  }
   0x3   :  { %v49_v7 = vadd.s32 4294967294, %v12_v5  ;;  %s41_s1 = sshll.u32 %s83_s13, 4  ;;  %v84_v12 = vmov 0.0   ;;  %s42_s1 = int_to_ptr.vmem [resolvable:$true] %s41_s1 }
   0x4   :  { %v18_v4 = vshrl.u32 %v17_v3, 7  ;;  %s57_s14 = scalar_lea.vmem %s42_s1, 128  ;;  %p62_p1 = scmp.lt.s32.totalorder %s42_s1, %s42_s1 }
   0x5   :  { %p58_p0 = scmp.ne.s32.totalorder %s42_s1, %s57_s14  ;;  %p63_p2 = scmp.lt.s32.totalorder %s57_s14, %s57_s14 }
   0x6   :  { %56 = vset.pattern.permute.xlu0 %v82_v2  ;;  %v19_v6 = vsub.s32 0, %v18_v4 }
   0x7   :  { %24 = vperm.xlu0 %56, %v13_v0   ;;  %p64_p3 = por %p63_p2, %p62_p1 }
   0x8   :  { %v20_v9 = vrot.slane %v12_v5, %v19_v6  ;;  %v29_v10 = vrot.slane %v49_v7, %v19_v6 }
   0x9   :  { %p65_p4 = pnand %p64_p3, %p58_p0 }
  0x81   :  { %v16_v8 = vpop.permute.xlu0 %15 }
  0x82   :  { %vm21_vm0 = vcmp.eq.s32.totalorder %v16_v8, %v20_v9 }
  0x86   :  { %v25_v11 = vpop.permute.xlu0 %24 }
  0x87   :  { %vm30_vm1 = vcmp.eq.s32.totalorder %v25_v11, %v29_v10 }
  0x88   :  { %vm31_vm2 = vmor %vm21_vm0, %vm30_vm1 }
  0x89   :  { %v50_v13 = vsel %vm31_vm2, 1.0, %v84_v12 }
  0x8a   :  { %34 = vst [vmem:[#allocation2] sm:$0xff] %v50_v13 }
  0x8b   :  { %68 = shalt.err (!%p65_p4)
}
  0x8c   :  { %s69_s16 = scalar_lea.hbm %s120_s2, 128 }
  0x8d   :  { %p70_p5 = scmp.ne.s32.totalorder %s120_s2, %s69_s16  ;;  %p73_p6 = scmp.lt.u32.totalorder %s69_s16, %s120_s2 }
  0x8f   :  { %p75_p7 = pnand %p73_p6, %p70_p5 }
  0x91   :  { %78 = shalt.err (!%p75_p7)
}
  0x92   :  { %44 = dma.vmem_to_hbm [thread:$0]  %s42_s1, 128, %s120_s2, [#allocation3]  }
  0x93   :  { %79 = dma.done.wait [#allocation3], 128  }
  0x94   :  { %80 = vsyncadd [#allocation3], 4294967168 }
  0x95   :  { %48 = vsyncpa [#allocation3], 1 }

</bundles_post_ra>
